<compile_context>
chip_gen: v7x
topology: tpu7x:2x2x1
jax: 0.10.0
libtpu: 0.0.40
codegen_flags: <defaults>
</compile_context>

<pallas_src>
import jax
import jax.numpy as jnp
import numpy as np
from jax import lax
from jax.experimental import pallas as pl
from jax.experimental.pallas import tpu as pltpu


# --------------------------------------------------------------------------
# helpers
# --------------------------------------------------------------------------
def _round_up(n, m):
    return ((int(n) + m - 1) // m) * m


def _sublane(itemsize):
    return {4: 8, 2: 16, 1: 32}.get(int(itemsize), 8)


def _vmem_capacity_bytes():
    try:
        return int(pltpu.get_tpu_info().vmem_capacity_bytes)
    except Exception:
        return 64 << 20  # conservative fallback (v7x-sized)


def _num_tensorcores():
    # Best-effort TC-per-chip query; default 1 (=> never shrink bt) so v5e/v6e
    # never pay extra grid steps.
    try:
        info = pltpu.get_tpu_info()
    except Exception:
        return 1
    for name in ("num_tensorcores", "tensorcores_per_chip", "num_cores",
                 "core_count"):
        v = getattr(info, name, None)
        if isinstance(v, int) and 0 < v <= 8:
            return v
    return 1


# --------------------------------------------------------------------------
# monolithic path: whole (bt, C, HWp) block per grid step
# --------------------------------------------------------------------------
def _channel_attention_kernel(beta_ref, x_ref, o_ref):
    # beta_ref: SMEM (1,) f32; x_ref / o_ref: VMEM (bt, C, HWp)
    a = x_ref[...]                                   # native dtype -> MXU

    # gram: contract last dim of both operands (no transpose copy).
    attn = lax.dot_general(
        a, a,
        dimension_numbers=(((2,), (2,)), ((0,), (0,))),
        preferred_element_type=jnp.float32)          # (bt, C, C) f32

    # softmax(rowmax - attn) == softmax(-attn); stable exponent rowmin - attn.
    e = jnp.exp(jnp.min(attn, axis=-1, keepdims=True) - attn)
    attn_sm = (e / jnp.sum(e, axis=-1, keepdims=True)).astype(a.dtype)

    feat_e = lax.dot_general(
        attn_sm, a,
        dimension_numbers=(((2,), (1,)), ((0,), (0,))),
        preferred_element_type=jnp.float32)          # (bt, C, HWp) f32

    o_ref[...] = a + (beta_ref[0] * feat_e).astype(o_ref.dtype)


def _channel_attention_monolithic(xr, beta, *, budget, vmem_limit, num_tc):
    B, C, HW = xr.shape
    dtype = xr.dtype
    itemsize = jnp.dtype(dtype).itemsize
    Cp = _round_up(C, _sublane(itemsize))
    Cl = _round_up(C, 128)
    HWp = _round_up(HW, 128)                         # lane-dense stores

    # per-element footprint: 2x double-buffered in + 2x out (native dtype),
    # f32 feat_e, plus (C, C)-sized f32 softmax intermediates (sublane/lane
    # padded).
    per_elem = Cp * HWp * (4 * itemsize + 4) + 4 * Cp * Cl * 4
    bt = int(max(1, min(B, budget // per_elem)))
    if num_tc >= 2 and B >= 2 and -(-B // bt) < 2:
        # only when the chip has 2 TCs: keep >=2 grid steps for core sharding.
        bt = -(-B // 2)
    Bp = _round_up(B, bt)                            # pad B: bt not divisor-bound
    grid_b = Bp // bt

    xp = xr
    if HWp != HW:
        xp = jnp.pad(xp, ((0, 0), (0, 0), (0, HWp - HW)))
    if Bp != B:
        xp = jnp.pad(xp, ((0, Bp - B), (0, 0), (0, 0)))

    out = pl.pallas_call(
        _channel_attention_kernel,
        out_shape=jax.ShapeDtypeStruct((Bp, C, HWp), dtype),
        grid_spec=pltpu.PrefetchScalarGridSpec(
            num_scalar_prefetch=0,
            grid=(grid_b,),
            in_specs=[
                pl.BlockSpec(memory_space=pltpu.MemorySpace.SMEM),   # beta
                pl.BlockSpec((bt, C, HWp), lambda b: (b, 0, 0)),     # x tile
            ],
            out_specs=pl.BlockSpec((bt, C, HWp), lambda b: (b, 0, 0)),
        ),
        compiler_params=pltpu.CompilerParams(
            dimension_semantics=("parallel",),
            vmem_limit_bytes=vmem_limit),
    )(beta, xp)

    return out[:B, :, :HW]


# --------------------------------------------------------------------------
# HW-chunked path: two streaming passes, VMEM bounded independent of H*W
# --------------------------------------------------------------------------
def _gram_softmax_kernel(x_ref, attn_ref, acc_ref):
    # x_ref: (1, C, chw) chunk; attn_ref: (1, C, C) softmaxed attention;
    # acc_ref: (1, C, C) f32 gram accumulator (resident across the hw axis).
    h = pl.program_id(1)

    @pl.when(h == 0)
    def _():
        acc_ref[...] = jnp.zeros_like(acc_ref)

    a = x_ref[...]
    acc_ref[...] += lax.dot_general(
        a, a,
        dimension_numbers=(((2,), (2,)), ((0,), (0,))),
        preferred_element_type=jnp.float32)

    @pl.when(h == pl.num_programs(1) - 1)
    def _():
        attn = acc_ref[...]
        e = jnp.exp(jnp.min(attn, axis=-1, keepdims=True) - attn)
        attn_ref[...] = (e / jnp.sum(e, axis=-1, keepdims=True)
                         ).astype(attn_ref.dtype)


def _apply_kernel(beta_ref, attn_ref, x_ref, o_ref):
    # attn_ref: (1, C, C); x_ref / o_ref: (1, C, chw)
    a = x_ref[...]
    feat_e = lax.dot_general(
        attn_ref[...], a,
        dimension_numbers=(((2,), (1,)), ((0,), (0,))),
        preferred_element_type=jnp.float32)
    o_ref[...] = a + (beta_ref[0] * feat_e).astype(o_ref.dtype)


def _channel_attention_chunked(xr, beta, *, budget, vmem_limit, hw_chunk=None):
    B, C, HW = xr.shape
    dtype = xr.dtype
    itemsize = jnp.dtype(dtype).itemsize
    Cp = _round_up(C, _sublane(itemsize))
    Cl = _round_up(C, 128)

    if hw_chunk is not None:
        chw = _round_up(hw_chunk, 128)
    else:
        # pass-2 (the heavier pass) footprint per lane column:
        # 2x in + 2x out (native dtype) + f32 feat_e; plus (C,C) constants.
        per_col = Cp * (4 * itemsize + 4)
        const = 3 * Cp * Cl * 4
        chw = max(128, ((budget - const) // per_col) // 128 * 128)

    hwp_min = _round_up(HW, 128)
    if chw >= hwp_min:
        chw = hwp_min
        HWp = hwp_min
    else:
        HWp = _round_up(HW, chw)                     # chw is a 128-multiple
    n_hw = HWp // chw

    xp = xr
    if HWp != HW:
        xp = jnp.pad(xp, ((0, 0), (0, 0), (0, HWp - HW)))

    # ---- pass 1: gram accumulation + softmax -> (B, C, C) attention --------
    attn = pl.pallas_call(
        _gram_softmax_kernel,
        out_shape=jax.ShapeDtypeStruct((B, C, C), dtype),
        grid_spec=pltpu.PrefetchScalarGridSpec(
            num_scalar_prefetch=0,
            grid=(B, n_hw),
            in_specs=[pl.BlockSpec((1, C, chw), lambda b, h: (b, 0, h))],
            out_specs=pl.BlockSpec((1, C, C), lambda b, h: (b, 0, 0)),
            scratch_shapes=[pltpu.VMEM((1, C, C), jnp.float32)],
        ),
        compiler_params=pltpu.CompilerParams(
            dimension_semantics=("parallel", "arbitrary"),
            vmem_limit_bytes=vmem_limit),
    )(xp)

    # ---- pass 2: out = x + beta * attn @ x, streamed over the same chunks --
    out = pl.pallas_call(
        _apply_kernel,
        out_shape=jax.ShapeDtypeStruct((B, C, HWp), dtype),
        grid_spec=pltpu.PrefetchScalarGridSpec(
            num_scalar_prefetch=0,
            grid=(B, n_hw),
            in_specs=[
                pl.BlockSpec(memory_space=pltpu.MemorySpace.SMEM),   # beta
                pl.BlockSpec((1, C, C), lambda b, h: (b, 0, 0)),     # attn
                pl.BlockSpec((1, C, chw), lambda b, h: (b, 0, h)),   # x chunk
            ],
            out_specs=pl.BlockSpec((1, C, chw), lambda b, h: (b, 0, h)),
        ),
        compiler_params=pltpu.CompilerParams(
            dimension_semantics=("parallel", "parallel"),
            vmem_limit_bytes=vmem_limit),
    )(beta, attn, xp)

    return out[:, :, :HW]


# --------------------------------------------------------------------------
# public wrapper
# --------------------------------------------------------------------------
def channel_attention(x, beta, *, force_chunked=False, hw_chunk=None):
    """x: (B, C, H, W); beta: (1,) float32 parameter."""
    B, C, H, W = x.shape
    HW = H * W
    xr = x.reshape(B, C, HW)

    # Generation-aware VMEM budgeting: ~96 MiB on v5e/v6e (128 MiB physical),
    # ~48 MiB on v7x (64 MiB physical); never request above physical capacity.
    vmem_cap = _vmem_capacity_bytes()
    budget = (vmem_cap * 3) // 4
    vmem_limit = int(min(vmem_cap - (6 << 20), budget + (16 << 20)))

    itemsize = jnp.dtype(x.dtype).itemsize
    Cp = _round_up(C, _sublane(itemsize))
    Cl = _round_up(C, 128)
    HWp = _round_up(HW, 128)
    per_elem = Cp * HWp * (4 * itemsize + 4) + 4 * Cp * Cl * 4

    if force_chunked or per_elem > budget:
        out = _channel_attention_chunked(
            xr, beta, budget=budget, vmem_limit=vmem_limit, hw_chunk=hw_chunk)
    else:
        out = _channel_attention_monolithic(
            xr, beta, budget=budget, vmem_limit=vmem_limit,
            num_tc=_num_tensorcores())

    return out.reshape(B, C, H, W)


# --------------------------------------------------------------------------
# pure-JAX reference mirroring the PyTorch forward
# --------------------------------------------------------------------------
def channel_attention_ref(x, beta):
    B, C, H, W = x.shape
    a = x.reshape(B, C, H * W).astype(jnp.float32)
    attn = jnp.einsum("bcn,bdn->bcd", a, a)
    attn_new = jnp.max(attn, axis=-1, keepdims=True) - attn
    attn_sm = jax.nn.softmax(attn_new, axis=-1)
    feat_e = jnp.einsum("bcd,bdn->bcn", attn_sm, a).reshape(B, C, H, W)
    return (beta[0] * feat_e + x.astype(jnp.float32)).astype(x.dtype)


if __name__ == "__main__":
    key = jax.random.PRNGKey(0)
    B, C, H, W = 2, 4, 16, 16
    x = jax.random.normal(key, (B, C, H, W), dtype=jnp.float32)

    # nn.Parameter(torch.zeros(1)) init; use a nonzero deterministic value so
    # the attention path actually contributes to the output.
    beta = jnp.array([0.5], dtype=jnp.float32)

    ref = channel_attention_ref(x, beta)

    # Monolithic path (small shapes take this one).
    out = jax.block_until_ready(channel_attention(x, beta))
    # Softmax normalizer is exact now; remaining divergence is MXU default-
    # precision matmul vs. the reference einsum.
    np.testing.assert_allclose(np.asarray(out), np.asarray(ref),
                               rtol=5e-3, atol=5e-3)

    # HW-chunked two-pass path (the one large shapes / v7x take), forced with
    # a small chunk so the gram accumulation actually spans multiple steps.
    out_c = jax.block_until_ready(
        channel_attention(x, beta, force_chunked=True, hw_chunk=128))
    np.testing.assert_allclose(np.asarray(out_c), np.asarray(ref),
                               rtol=5e-3, atol=5e-3)

    print("KERNEL_OK")
</pallas_src>

<mosaic_0001>
module attributes {stable_mosaic.version = 11 : i64} {
  func.func @_channel_attention_kernel(%arg0: i32, %arg1: memref<1xf32, #tpu.memory_space<smem>>, %arg2: memref<2x4x256xf32, #tpu.memory_space<vmem>>, %arg3: memref<2x4x256xf32, #tpu.memory_space<vmem>>) attributes {dimension_semantics = [#tpu.dimension_semantics<parallel>], iteration_bounds = array<i64: 1>, scalar_prefetch = 0 : i64, scratch_operands = 0 : i64, tpu.core_type = #tpu.core_type<tc>, window_params = [{transform_indices = @transform_0, window_bounds = array<i64: 1>}, {transform_indices = @transform_1, window_bounds = array<i64: 2, 4, 256>}, {transform_indices = @transform_2, window_bounds = array<i64: 2, 4, 256>}]} {
    %c0 = arith.constant 0 : index
    %c0_0 = arith.constant 0 : index
    %c0_1 = arith.constant 0 : index
    %0 = vector.load %arg2[%c0, %c0_0, %c0_1] : memref<2x4x256xf32, #tpu.memory_space<vmem>>, vector<2x4x256xf32>
    %cst = arith.constant dense<0.000000e+00> : vector<2x4x4xf32>
    %1 = tpu.matmul %0, %0, %cst {dimension_numbers = #tpu.dot_dimension_numbers<[2], [2], [1], [1], [0, 0, 0, 1, 1, 1], [0], [0]>} : vector<2x4x256xf32>, vector<2x4x256xf32>, vector<2x4x4xf32> -> vector<2x4x4xf32>
    %cst_2 = arith.constant dense<0x7F800000> : vector<2x4xf32>
    %2 = vector.multi_reduction <minimumf>, %1, %cst_2 [2] : vector<2x4x4xf32> to vector<2x4xf32>
    %3 = vector.shape_cast %2 : vector<2x4xf32> to vector<2x4x1xf32>
    %4 = vector.broadcast %3 : vector<2x4x1xf32> to vector<2x4x4xf32>
    %5 = arith.subf %4, %1 : vector<2x4x4xf32>
    %6 = math.exp %5 : vector<2x4x4xf32>
    %cst_3 = arith.constant dense<0.000000e+00> : vector<2x4xf32>
    %7 = vector.multi_reduction <add>, %6, %cst_3 [2] : vector<2x4x4xf32> to vector<2x4xf32>
    %8 = vector.shape_cast %7 : vector<2x4xf32> to vector<2x4x1xf32>
    %9 = vector.broadcast %8 : vector<2x4x1xf32> to vector<2x4x4xf32>
    %10 = arith.divf %6, %9 : vector<2x4x4xf32>
    %cst_4 = arith.constant dense<0.000000e+00> : vector<2x4x256xf32>
    %11 = tpu.matmul %10, %0, %cst_4 {dimension_numbers = #tpu.dot_dimension_numbers<[2], [1], [1], [2], [0, 0, 0, 1, 1, 2], [0], [0]>} : vector<2x4x4xf32>, vector<2x4x256xf32>, vector<2x4x256xf32> -> vector<2x4x256xf32>
    %c0_5 = arith.constant 0 : index
    %12 = memref.load %arg1[%c0_5] : memref<1xf32, #tpu.memory_space<smem>>
    %13 = vector.broadcast %12 : f32 to vector<2x4x256xf32>
    %14 = arith.mulf %13, %11 : vector<2x4x256xf32>
    %15 = arith.addf %0, %14 : vector<2x4x256xf32>
    %c0_6 = arith.constant 0 : index
    %c0_7 = arith.constant 0 : index
    %c0_8 = arith.constant 0 : index
    %16 = vector.load %arg3[%c0_6, %c0_7, %c0_8] : memref<2x4x256xf32, #tpu.memory_space<vmem>>, vector<2x4x256xf32>
    tpu.vector_store %arg3[%c0_6, %c0_7, %c0_8], %15 {strides = array<i32>} : memref<2x4x256xf32, #tpu.memory_space<vmem>>, vector<2x4x256xf32>,
    return
  }
  func.func @transform_0(%arg0: i32) -> i32 {
    %c0_i32 = arith.constant 0 : i32
    %c0_i32_0 = arith.constant 0 : i32
    return %c0_i32 : i32
  }
  func.func @transform_1(%arg0: i32) -> (i32, i32, i32) {
    %c0_i32 = arith.constant 0 : i32
    %c0_i32_0 = arith.constant 0 : i32
    %c0_i32_1 = arith.constant 0 : i32
    return %arg0, %c0_i32, %c0_i32_0 : i32, i32, i32
  }
  func.func @transform_2(%arg0: i32) -> (i32, i32, i32) {
    %c0_i32 = arith.constant 0 : i32
    %c0_i32_0 = arith.constant 0 : i32
    %c0_i32_1 = arith.constant 0 : i32
    return %arg0, %c0_i32, %c0_i32_0 : i32, i32, i32
  }
}

</mosaic_0001>

<bundles_post_ra>
// kernel: tpu_custom_call.1
= control target key start
LH: loop header
LB: loop body
LE: loop exit
PB: predicated region body
PF: predicated region fallthrough
CT: control target
= control target key end

     0   :  { %8 = vsyncpa [#allocation4], 0  ;;  %s533_s0 = inlined_call_operand.<no memory space> [shape: f32[1], index: 0, kind: input, shape index: {}]   ;;  %s534_s1 = inlined_call_operand.hbm [shape: f32[2,4,256], index: 1, kind: input, shape index: {}]   ;;  %s535_s2 = inlined_call_operand.hbm [shape: f32[2,4,256], index: 2, kind: output, shape index: {}]  }
   0x1   :  { %9 = vsyncpa [#allocation5], 0  ;;  %s460_s9 = smov [#allocation3]   ;;  %s412_s13 = scalar_lea.hbm %s534_s1, 256 }
   0x2   :  { %s17_s10 = sshll.u32 %s460_s9, 4  ;;  %p413_p0 = scmp.ne.s32.totalorder %s534_s1, %s412_s13  ;;  %s18_s10 = int_to_ptr.vmem [resolvable:$true] %s17_s10 }
   0x3   :  { %p416_p1 = scmp.lt.u32.totalorder %s412_s13, %s534_s1 }
   0x5   :  { %p418_p2 = pnand %p416_p1, %p413_p0 }
   0x7   :  { %421 = shalt.err (!%p418_p2)
}
   0x8   :  { %s422_s18 = scalar_lea.vmem %s18_s10, 256  ;;  %p427_p4 = scmp.lt.s32.totalorder %s18_s10, %s18_s10 }
   0x9   :  { %p423_p3 = scmp.ne.s32.totalorder %s18_s10, %s422_s18  ;;  %p428_p5 = scmp.lt.s32.totalorder %s422_s18, %s422_s18 }
   0xb   :  { %p429_p6 = por %p428_p5, %p427_p4 }
   0xd   :  { %p430_p7 = pnand %p429_p6, %p423_p3 }
   0xf   :  { %433 = shalt.err (!%p430_p7)
}
  0x10   :  { %s461_s19 = smov 128   ;;  %s462_s20 = smov 8  }
  0x11   :  { %23 = dma.hbm_to_vmem [thread:$0]  %s534_s1, 256, %s18_s10, [#allocation4], %s461_s19, %s461_s19, %s462_s20  }
  0x12   :  { %456 = dma.done.wait [#allocation4], 256  }
  0x13   :  { %457 = vsyncadd [#allocation4], 4294967040  ;;  %v495_v0 = vld [vmem:[#allocation3] sm:$0xff]  ;;  %v497_v1 = vld [vmem:[#allocation3 + $0x8] sm:$0xff]  ;;  %vm175_vm0 = vcmask 27648   ;;  %vm202_vm1 = vcmask 1043456   ;;  %v357_v27 = vstv %s533_s0 }
  0x14   :  { %v30_v2 = vcombine.high %v495_v0, %v495_v0  ;;  %v103_v3 = vcombine.high %v497_v1, %v497_v1  ;;  %v463_v20 = vmov 0.0   ;;  %vm198_vm2 = vcmask 31744   ;;  %s464_s24 = smov [#allocation6]  }
  0x15   :  { %s379_s25 = sshll.u32 %s464_s24, 4  ;;  %s380_s25 = int_to_ptr.vmem [resolvable:$true] %s379_s25 }
  0x16   :  { %32 = vmatprep.subr.mxu0 %v30_v2  ;;  %96 = vmatprep.mubr.f32.mxu0 %v30_v2  ;;  %s434_s0 = scalar_lea.vmem %s380_s25, 256  ;;  %p439_p9 = scmp.lt.s32.totalorder %s380_s25, %s380_s25 }
  0x17   :  { %33 = vmatpush1.xpose.msra.mxu0 %v495_v0  ;;  %105 = vmatprep.subr.mxu1 %v103_v3  ;;  %p435_p8 = scmp.ne.s32.totalorder %s380_s25, %s434_s0  ;;  %p440_p10 = scmp.lt.s32.totalorder %s434_s0, %s434_s0 }
  0x18   :  { %106 = vmatpush1.xpose.msra.mxu1 %v497_v1  ;;  %169 = vmatprep.mubr.f32.mxu1 %v103_v3 }
  0x19   :  { %391 = vmatprep.subr.msk.mxu0 %vm202_vm1, %v30_v2  ;;  %394 = vmatprep.subr.msk.mxu1 %vm202_vm1, %v103_v3  ;;  %p441_p11 = por %p440_p10, %p439_p9 }
  0x1a   :  { %97 = vmatmul.mubr.f32.vlgmr.msra.gmra.mrb[0].mxu0 %v495_v0 }
  0x1b   :  { %170 = vmatmul.mubr.f32.vlgmr.msra.gmra.mrb[0].mxu1 %v497_v1  ;;  %392 = vmatpush1.msk.msra.mxu0 %vm202_vm1, %v495_v0  ;;  %p442_p12 = pnand %p441_p11, %p435_p8 }
  0x1c   :  { %271 = vmatprep.mubr.f32.mxu0 %v463_v20  ;;  %395 = vmatpush1.msk.msra.mxu1 %vm202_vm1, %v497_v1 }
  0x1d   :  { %349 = vmatprep.mubr.f32.mxu1 %v463_v20 }
  0xed   :  { %v98_v4 = vpop.f32.mrb[0].mxu0 }
  0xee   :  { %v100_v5 = vpop.f32.mrb[1].mxu0  ;;  %v176_v6 = vsel %vm175_vm0, %v98_v4, inf  ;;  %v171_v7 = vpop.f32.mrb[0].mxu1 }
  0xef   :  { %177 = vmin.xlane.f32.xlu0 %v176_v6  ;;  %v173_v8 = vpop.f32.mrb[1].mxu1  ;;  %v179_v9 = vsel %vm175_vm0, %v171_v7, inf }
  0xf3   :  { %180 = vmin.xlane.f32.xlu0 %v179_v9 }
 0x17c   :  { %v178_v10 = vpop.xlane.xlu0 %177 }
 0x17d   :  { %v182_v11 = vsub.f32 %v178_v10, %v98_v4 }
 0x17f   :  { %v184_v12 = vmul.f32 1.442695, %v182_v11 }
 0x180   :  { %v181_v13 = vpop.xlane.xlu0 %180 }
 0x181   :  { %404 = vpow2.f32 %v184_v12  ;;  %v183_v14 = vsub.f32 %v181_v13, %v171_v7 }
 0x183   :  { %v186_v15 = vmul.f32 1.442695, %v183_v14 }
 0x185   :  { %406 = vpow2.f32 %v186_v15 }
 0x18b   :  { %v405_v16 = vpop.eup %404 }
 0x18c   :  { %v188_v17 = vsel %vm175_vm0, %v405_v16, 0.0 }
 0x18d   :  { %189 = vadd.xlane.f32.xlu1 %v188_v17 }
 0x18f   :  { %v407_v18 = vpop.eup %406 }
 0x190   :  { %v191_v19 = vsel %vm175_vm0, %v407_v18, 0.0 }
 0x191   :  { %192 = vadd.xlane.f32.xlu1 %v191_v19 }
 0x21a   :  { %v190_v21 = vpop.xlane.xlu1 %189 }
 0x21b   :  { %408 = vrcp.f32 %v190_v21 }
 0x21e   :  { %v193_v22 = vpop.xlane.xlu1 %192 }
 0x21f   :  { %410 = vrcp.f32 %v193_v22 }
 0x225   :  { %v409_v23 = vpop.eup %408 }
 0x226   :  { %v195_v24 = vmul.f32 %v409_v23, %v405_v16 }
 0x228   :  { %393 = vmatmul.mubr.msk.f32.vlgmr.msra.gmra.mrb[2].mxu0 %vm198_vm2, %v195_v24 }
 0x229   :  { %v411_v25 = vpop.eup %410 }
 0x22a   :  { %v197_v26 = vmul.f32 %v411_v25, %v407_v18 }
 0x22c   :  { %396 = vmatmul.mubr.msk.f32.vlgmr.msra.gmra.mrb[2].mxu1 %vm198_vm2, %v197_v26 }
 0x2fb   :  { %v273_v28 = vpop.f32.mrb[2].mxu0 }
 0x2fc   :  { %v358_v29 = vmul.f32 %v357_v27, %v273_v28  ;;  %v275_v30 = vpop.f32.mrb[3].mxu0 }
 0x2fd   :  { %v359_v31 = vmul.f32 %v357_v27, %v275_v30 }
 0x2ff   :  { %v366_v32 = vcombine.low %v358_v29, %v359_v31  ;;  %v351_v33 = vpop.f32.mrb[2].mxu1 }
 0x300   :  { %v360_v34 = vmul.f32 %v357_v27, %v351_v33  ;;  %v353_v35 = vpop.f32.mrb[3].mxu1 }
 0x301   :  { %v370_v36 = vadd.f32 %v366_v32, %v495_v0  ;;  %v361_v37 = vmul.f32 %v357_v27, %v353_v35 }
 0x303   :  { %372 = vst [vmem:[#allocation6] sm:$0xff] %v370_v36  ;;  %v367_v38 = vcombine.low %v360_v34, %v361_v37 }
 0x305   :  { %v371_v39 = vadd.f32 %v367_v38, %v497_v1 }
 0x307   :  { %373 = vst [vmem:[#allocation6 + $0x8] sm:$0xff] %v371_v39 }
 0x308   :  { %445 = shalt.err (!%p442_p12)
}
 0x309   :  { %s446_s28 = scalar_lea.hbm %s535_s2, 256 }
 0x30a   :  { %p447_p13 = scmp.ne.s32.totalorder %s535_s2, %s446_s28  ;;  %p450_p0 = scmp.lt.u32.totalorder %s446_s28, %s535_s2 }
 0x30c   :  { %p452_p1 = pnand %p450_p0, %p447_p13 }
 0x30e   :  { %455 = shalt.err (!%p452_p1)
}
 0x30f   :  { %385 = dma.vmem_to_hbm [thread:$0]  %s380_s25, 256, %s535_s2, [#allocation5], %s461_s19, %s461_s19, %s462_s20  }
 0x310   :  { %458 = dma.done.wait [#allocation5], 256  }
 0x311   :  { %459 = vsyncadd [#allocation5], 4294967040 }
 0x312   :  { %389 = vsyncpa [#allocation4], 1 }
 0x313   :  { %390 = vsyncpa [#allocation5], 1 }

</bundles_post_ra>
